<compile_context>
chip_gen: v6e
topology: v6e:2x2x1
jax: 0.10.0
libtpu: 0.0.40
codegen_flags: <defaults>
</compile_context>

<pallas_src>
import jax
import jax.numpy as jnp
from jax.experimental import pallas as pl
from jax.experimental.pallas import tpu as pltpu


def _round_up(x, m):
    return ((x + m - 1) // m) * m


def _additive_attention_kernel(cand_ref, wbd_ref, bias_ref, qmat_ref,
                               emat_ref, gmat_ref, out_ref):
    # cand_ref: (TB, S*D)   storage dtype (flattened on host; no in-kernel reshape)
    # wbd_ref:  (S*D, S*Q)  storage dtype, block-diagonal W^T
    # bias_ref: (1, S*Q)    f32, bias tiled S times
    # qmat_ref: (S*Q, S)    f32, block-diagonal attention query vector
    # emat_ref: (S, S*D)    f32, weight "expand" matrix  (w[b,s] -> lanes s*D..s*D+D-1)
    # gmat_ref: (S*D, Dp)   f32, fold matrix (sums over s, pads D up to Dp lanes)
    # out_ref:  (TB, Dp)
    cand = cand_ref[...]                                           # (TB, S*D)

    # temp = tanh(cand @ W^T + b), unrolled per position: lane-dense (TB, S*Q).
    temp = jnp.tanh(
        jnp.dot(cand, wbd_ref[...], preferred_element_type=jnp.float32)
        + bias_ref[...]
    )

    # scores[b, s] = temp[b, s*Q:(s+1)*Q] . q   — second MXU matmul, no relayout.
    scores = jnp.dot(temp, qmat_ref[...],
                     preferred_element_type=jnp.float32)           # (TB, S)

    # Numerically-stable softmax over S (lane axis).  Exact divide: weights
    # sum to 1 (the approximate reciprocal was the previous accuracy failure).
    m = jnp.max(scores, axis=-1, keepdims=True)
    e = jnp.exp(scores - m)
    denom = jnp.sum(e, axis=-1, keepdims=True)
    weights = e / denom                                            # (TB, S)

    # target[b, d] = sum_s weights[b, s] * cand[b, s*D + d]
    # Broadcast the weights along lanes with one matmul (E), multiply, then
    # fold the S positions with another matmul (G) — all on the idle MXU.
    w_exp = jnp.dot(weights, emat_ref[...],
                    preferred_element_type=jnp.float32)            # (TB, S*D)
    prod = w_exp * cand.astype(jnp.float32)                        # (TB, S*D) f32
    target = jnp.dot(prod, gmat_ref[...],
                     preferred_element_type=jnp.float32)           # (TB, Dp)
    out_ref[...] = target.astype(out_ref.dtype)


def _vmem_limits():
    """(vmem_limit_bytes, per-buffer budget bytes), sized per chip generation."""
    try:
        info = pltpu.get_tpu_info()
        cap = getattr(info, "vmem_capacity_bytes", 64 << 20)
    except Exception:
        cap = 64 << 20                      # conservative: assume smallest (v7x) VMEM
    if cap >= (96 << 20):                   # v5e / v6e: 128 MiB physical VMEM
        return 64 << 20, 16 << 20
    return 48 << 20, 8 << 20                # v7x: 64 MiB physical VMEM


def _pick_block_b(B, SD, itemsize, budget_bytes, sublane):
    """Largest batch block TB that (a) divides B, (b) is sublane-aligned (or == B),
    and (c) whose PADDED, double-buffered footprint fits the per-buffer budget.
    Keeps >= 2 grid steps when a decent smaller block exists (v7x: 2 TensorCores)."""
    legal = [tb for tb in range(1, B + 1)
             if B % tb == 0 and (tb % sublane == 0 or tb == B)]
    fits = [tb for tb in legal
            if 2 * _round_up(tb, sublane) * _round_up(SD, 128) * itemsize
            <= budget_bytes]
    if not fits:
        return min(legal)
    best = max(fits)
    if best == B:
        smaller = [t for t in fits if t < B and t >= sublane]
        if smaller:
            best = max(smaller)             # cap at B//2 -> both v7x cores get work
    return best


def additive_attention(candidate_vector, weight, bias, query_vector, *, block_b=None):
    """candidate_vector: (B, S, D); weight: (Q, D); bias: (Q,); query_vector: (Q,)."""
    B, S, D = candidate_vector.shape
    Q, D_w = weight.shape
    assert D_w == D, "weight must be (query_vector_dim, candidate_vector_dim)"
    SD, SQ = S * D, S * Q
    Dp = _round_up(D, 128)                  # lane-dense (padded) output width

    dtype = candidate_vector.dtype
    itemsize = jnp.dtype(dtype).itemsize
    sublane = 8 if itemsize >= 4 else (16 if itemsize == 2 else 32)

    vmem_limit, budget = _vmem_limits()
    if block_b is None:
        block_b = _pick_block_b(B, SD, itemsize, budget, sublane)
    TB = block_b
    assert B % TB == 0, f"block_b={TB} must divide batch size B={B}"

    # ---- Host-side (one-time) layout plumbing; nothing below runs per step ----
    cand_flat = candidate_vector.reshape(B, SD)                     # free reshape
    eye_s = jnp.eye(S, dtype=jnp.float32)
    # Block-diagonal W^T: (S*D, S*Q).  MXU consumes it in the storage dtype.
    w_bd = jnp.kron(eye_s, weight.T.astype(jnp.float32)).astype(dtype)
    bias_t = jnp.tile(bias.astype(jnp.float32), S).reshape(1, SQ)   # (1, S*Q)
    # Block-diagonal attention-query matrix: (S*Q, S).
    qmat = jnp.kron(eye_s, query_vector.astype(jnp.float32).reshape(Q, 1))
    # Expand matrix E: (S, S*D), E[s, s*D + d] = 1.
    e_mat = jnp.kron(eye_s, jnp.ones((1, D), jnp.float32))
    # Fold matrix G: (S*D, Dp), G[s*D + d, d] = 1 (columns >= D are zero padding).
    g_mat = jnp.kron(jnp.ones((S, 1), jnp.float32), jnp.eye(D, Dp, dtype=jnp.float32))

    out = pl.pallas_call(
        _additive_attention_kernel,
        out_shape=jax.ShapeDtypeStruct((B, Dp), dtype),
        grid_spec=pltpu.PrefetchScalarGridSpec(
            num_scalar_prefetch=0,
            grid=(B // TB,),
            in_specs=[
                pl.BlockSpec((TB, SD), lambda b: (b, 0)),   # streamed candidate block
                pl.BlockSpec((SD, SQ), lambda b: (0, 0)),   # block-diag W^T (resident)
                pl.BlockSpec((1, SQ), lambda b: (0, 0)),    # tiled bias
                pl.BlockSpec((SQ, S), lambda b: (0, 0)),    # block-diag query matrix
                pl.BlockSpec((S, SD), lambda b: (0, 0)),    # expand matrix E
                pl.BlockSpec((SD, Dp), lambda b: (0, 0)),   # fold matrix G
            ],
            out_specs=pl.BlockSpec((TB, Dp), lambda b: (b, 0)),  # lane-dense output slab
        ),
        compiler_params=pltpu.CompilerParams(
            dimension_semantics=("parallel",),
            vmem_limit_bytes=vmem_limit,
        ),
    )(cand_flat, w_bd, bias_t, qmat, e_mat, g_mat)

    return out if Dp == D else out[:, :D]


def additive_attention_ref(candidate_vector, weight, bias, query_vector):
    temp = jnp.tanh(jnp.einsum("bsd,qd->bsq", candidate_vector, weight) + bias)
    scores = jnp.einsum("bsq,q->bs", temp, query_vector)
    w = jax.nn.softmax(scores, axis=1)
    return jnp.einsum("bs,bsd->bd", w, candidate_vector)


if __name__ == "__main__":
    # Small shapes consistent with the module's forward.
    B, S = 16, 8
    query_vector_dim = 16       # Q
    candidate_vector_dim = 32   # D

    key = jax.random.PRNGKey(0)
    k_cand, k_w, k_b, k_q = jax.random.split(key, 4)

    candidate_vector = jax.random.normal(
        k_cand, (B, S, candidate_vector_dim), dtype=jnp.float32)

    # Deterministic parameter init mirroring nn.Linear / uniform_(-0.1, 0.1).
    limit = 1.0 / (candidate_vector_dim ** 0.5)
    weight = jax.random.uniform(
        k_w, (query_vector_dim, candidate_vector_dim),
        minval=-limit, maxval=limit, dtype=jnp.float32)
    bias = jax.random.uniform(
        k_b, (query_vector_dim,), minval=-limit, maxval=limit, dtype=jnp.float32)
    attention_query_vector = jax.random.uniform(
        k_q, (query_vector_dim,), minval=-0.1, maxval=0.1, dtype=jnp.float32)

    # f32 run: auto-picked TB (8 for B=16) -> grid=(2,), sublane-dense blocks.
    out = additive_attention(candidate_vector, weight, bias, attention_query_vector)
    out = jax.block_until_ready(out)
    ref = additive_attention_ref(candidate_vector, weight, bias, attention_query_vector)
    assert out.shape == (B, candidate_vector_dim)
    assert jnp.allclose(out, ref, atol=1e-4, rtol=1e-4), "f32 mismatch vs reference"

    # bf16 storage run: halves HBM traffic; MXU consumes bf16 natively with f32
    # accumulation, post-matmul softmax math stays f32.
    cand_bf16 = candidate_vector.astype(jnp.bfloat16)
    w_bf16 = weight.astype(jnp.bfloat16)
    out16 = additive_attention(cand_bf16, w_bf16, bias, attention_query_vector)
    out16 = jax.block_until_ready(out16)
    ref16 = additive_attention_ref(
        cand_bf16.astype(jnp.float32), w_bf16.astype(jnp.float32),
        bias, attention_query_vector)
    assert out16.shape == (B, candidate_vector_dim)
    assert jnp.allclose(out16.astype(jnp.float32), ref16, atol=2e-2, rtol=2e-2), \
        "bf16 mismatch vs reference"

    print("KERNEL_OK")
</pallas_src>

<mosaic_0001>
module attributes {stable_mosaic.version = 11 : i64} {
  func.func @_additive_attention_kernel(%arg0: i32, %arg1: memref<8x256xf32, #tpu.memory_space<vmem>>, %arg2: memref<256x128xf32, #tpu.memory_space<vmem>>, %arg3: memref<1x128xf32, #tpu.memory_space<vmem>>, %arg4: memref<128x8xf32, #tpu.memory_space<vmem>>, %arg5: memref<8x256xf32, #tpu.memory_space<vmem>>, %arg6: memref<256x128xf32, #tpu.memory_space<vmem>>, %arg7: memref<8x128xf32, #tpu.memory_space<vmem>>) attributes {dimension_semantics = [#tpu.dimension_semantics<parallel>], iteration_bounds = array<i64: 2>, scalar_prefetch = 0 : i64, scratch_operands = 0 : i64, tpu.core_type = #tpu.core_type<tc>, window_params = [{transform_indices = @transform_0, window_bounds = array<i64: 8, 256>}, {pipeline_mode = #tpu.pipeline_mode<synchronous>, transform_indices = @transform_1, window_bounds = array<i64: 256, 128>}, {pipeline_mode = #tpu.pipeline_mode<synchronous>, transform_indices = @transform_2, window_bounds = array<i64: 1, 128>}, {pipeline_mode = #tpu.pipeline_mode<synchronous>, transform_indices = @transform_3, window_bounds = array<i64: 128, 8>}, {pipeline_mode = #tpu.pipeline_mode<synchronous>, transform_indices = @transform_4, window_bounds = array<i64: 8, 256>}, {pipeline_mode = #tpu.pipeline_mode<synchronous>, transform_indices = @transform_5, window_bounds = array<i64: 256, 128>}, {transform_indices = @transform_6, window_bounds = array<i64: 8, 128>}]} {
    %c0 = arith.constant 0 : index
    %c0_0 = arith.constant 0 : index
    %0 = vector.load %arg1[%c0, %c0_0] : memref<8x256xf32, #tpu.memory_space<vmem>>, vector<8x256xf32>
    %c0_1 = arith.constant 0 : index
    %c0_2 = arith.constant 0 : index
    %1 = vector.load %arg2[%c0_1, %c0_2] : memref<256x128xf32, #tpu.memory_space<vmem>>, vector<256x128xf32>
    %cst = arith.constant dense<0.000000e+00> : vector<8x128xf32>
    %2 = tpu.matmul %0, %1, %cst {dimension_numbers = #tpu.dot_dimension_numbers<[1], [0], [0], [1], [0, 0, 1, 1], [], []>} : vector<8x256xf32>, vector<256x128xf32>, vector<8x128xf32> -> vector<8x128xf32>
    %c0_3 = arith.constant 0 : index
    %c0_4 = arith.constant 0 : index
    %3 = vector.load %arg3[%c0_3, %c0_4] : memref<1x128xf32, #tpu.memory_space<vmem>>, vector<1x128xf32>
    %4 = vector.broadcast %3 : vector<1x128xf32> to vector<8x128xf32>
    %5 = arith.addf %2, %4 : vector<8x128xf32>
    %6 = math.tanh %5 : vector<8x128xf32>
    %c0_5 = arith.constant 0 : index
    %c0_6 = arith.constant 0 : index
    %7 = vector.load %arg4[%c0_5, %c0_6] : memref<128x8xf32, #tpu.memory_space<vmem>>, vector<128x8xf32>
    %cst_7 = arith.constant dense<0.000000e+00> : vector<8x8xf32>
    %8 = tpu.matmul %6, %7, %cst_7 {dimension_numbers = #tpu.dot_dimension_numbers<[1], [0], [0], [1], [0, 0, 1, 1], [], []>} : vector<8x128xf32>, vector<128x8xf32>, vector<8x8xf32> -> vector<8x8xf32>
    %cst_8 = arith.constant dense<0xFF800000> : vector<8xf32>
    %9 = vector.multi_reduction <maximumf>, %8, %cst_8 [1] : vector<8x8xf32> to vector<8xf32>
    %10 = vector.shape_cast %9 : vector<8xf32> to vector<8x1xf32>
    %11 = vector.broadcast %10 : vector<8x1xf32> to vector<8x8xf32>
    %12 = arith.subf %8, %11 : vector<8x8xf32>
    %13 = math.exp %12 : vector<8x8xf32>
    %cst_9 = arith.constant dense<0.000000e+00> : vector<8xf32>
    %14 = vector.multi_reduction <add>, %13, %cst_9 [1] : vector<8x8xf32> to vector<8xf32>
    %15 = vector.shape_cast %14 : vector<8xf32> to vector<8x1xf32>
    %16 = vector.broadcast %15 : vector<8x1xf32> to vector<8x8xf32>
    %17 = arith.divf %13, %16 : vector<8x8xf32>
    %c0_10 = arith.constant 0 : index
    %c0_11 = arith.constant 0 : index
    %18 = vector.load %arg5[%c0_10, %c0_11] : memref<8x256xf32, #tpu.memory_space<vmem>>, vector<8x256xf32>
    %cst_12 = arith.constant dense<0.000000e+00> : vector<8x256xf32>
    %19 = tpu.matmul %17, %18, %cst_12 {dimension_numbers = #tpu.dot_dimension_numbers<[1], [0], [0], [1], [0, 0, 1, 1], [], []>} : vector<8x8xf32>, vector<8x256xf32>, vector<8x256xf32> -> vector<8x256xf32>
    %20 = arith.mulf %19, %0 : vector<8x256xf32>
    %c0_13 = arith.constant 0 : index
    %c0_14 = arith.constant 0 : index
    %21 = vector.load %arg6[%c0_13, %c0_14] : memref<256x128xf32, #tpu.memory_space<vmem>>, vector<256x128xf32>
    %cst_15 = arith.constant dense<0.000000e+00> : vector<8x128xf32>
    %22 = tpu.matmul %20, %21, %cst_15 {dimension_numbers = #tpu.dot_dimension_numbers<[1], [0], [0], [1], [0, 0, 1, 1], [], []>} : vector<8x256xf32>, vector<256x128xf32>, vector<8x128xf32> -> vector<8x128xf32>
    %c0_16 = arith.constant 0 : index
    %c0_17 = arith.constant 0 : index
    %23 = vector.load %arg7[%c0_16, %c0_17] : memref<8x128xf32, #tpu.memory_space<vmem>>, vector<8x128xf32>
    tpu.vector_store %arg7[%c0_16, %c0_17], %22 {strides = array<i32>} : memref<8x128xf32, #tpu.memory_space<vmem>>, vector<8x128xf32>,
    return
  }
  func.func @transform_0(%arg0: i32) -> (i32, i32) {
    %c0_i32 = arith.constant 0 : i32
    %c0_i32_0 = arith.constant 0 : i32
    return %arg0, %c0_i32 : i32, i32
  }
  func.func @transform_1(%arg0: i32) -> (i32, i32) {
    %c0_i32 = arith.constant 0 : i32
    %c0_i32_0 = arith.constant 0 : i32
    %c0_i32_1 = arith.constant 0 : i32
    return %c0_i32, %c0_i32_0 : i32, i32
  }
  func.func @transform_2(%arg0: i32) -> (i32, i32) {
    %c0_i32 = arith.constant 0 : i32
    %c0_i32_0 = arith.constant 0 : i32
    %c0_i32_1 = arith.constant 0 : i32
    return %c0_i32, %c0_i32_0 : i32, i32
  }
  func.func @transform_3(%arg0: i32) -> (i32, i32) {
    %c0_i32 = arith.constant 0 : i32
    %c0_i32_0 = arith.constant 0 : i32
    %c0_i32_1 = arith.constant 0 : i32
    return %c0_i32, %c0_i32_0 : i32, i32
  }
  func.func @transform_4(%arg0: i32) -> (i32, i32) {
    %c0_i32 = arith.constant 0 : i32
    %c0_i32_0 = arith.constant 0 : i32
    %c0_i32_1 = arith.constant 0 : i32
    return %c0_i32, %c0_i32_0 : i32, i32
  }
  func.func @transform_5(%arg0: i32) -> (i32, i32) {
    %c0_i32 = arith.constant 0 : i32
    %c0_i32_0 = arith.constant 0 : i32
    %c0_i32_1 = arith.constant 0 : i32
    return %c0_i32, %c0_i32_0 : i32, i32
  }
  func.func @transform_6(%arg0: i32) -> (i32, i32) {
    %c0_i32 = arith.constant 0 : i32
    %c0_i32_0 = arith.constant 0 : i32
    return %arg0, %c0_i32 : i32, i32
  }
}

</mosaic_0001>

<bundles_post_ra>
// kernel: tpu_custom_call.1
= control target key start
LH: loop header
LB: loop body
LE: loop exit
PB: predicated region body
PF: predicated region fallthrough
CT: control target
= control target key end

     0   :  { %11 = vsyncpa [#allocation3], 0  ;;  %s1358_s0 = inlined_call_operand.vmem [shape: f32[16,256], index: 0, kind: input, shape index: {}]   ;;  %s1359_s1 = inlined_call_operand.hbm [shape: f32[256,128], index: 1, kind: input, shape index: {}]   ;;  %s1360_s2 = inlined_call_operand.vmem [shape: f32[1,128], index: 2, kind: input, shape index: {}]   ;;  %s1361_s3 = inlined_call_operand.vmem [shape: f32[128,8], index: 3, kind: input, shape index: {}]   ;;  %s1362_s4 = inlined_call_operand.vmem [shape: f32[8,256], index: 4, kind: input, shape index: {}]   ;;  %s1363_s5 = inlined_call_operand.hbm [shape: f32[256,128], index: 5, kind: input, shape index: {}]   ;;  %s1364_s6 = inlined_call_operand.hbm [shape: f32[16,128], index: 6, kind: output, shape index: {}]  }
   0x1   :  { %12 = vsyncpa [#allocation6], 0 }
   0x2   :  { %13 = vsyncpa [#allocation4], 0 }
   0x3   :  { %15 = vsyncpa [#allocation4 + $0x1], 0  ;;  %s1140_s21 = smov 0   ;;  %s1142_s22 = smov 0  }
   0x4   :  { %s1144_s23 = smov 0   ;;  %s1146_s24 = smov 0  }
   0x5 LB: > { %s1161_s25 = sadd.s32 4294967295, %s1096_s24   ;;  %s766_s26 = sadd.s32 4294967294, %s1096_s24   ;;  %s1096_s24 = sphi %s1146_s24, %s1378_s24   ;;  %s1092_s23 = sphi %s1144_s23, %s1377_s23   ;;  %s1088_s22 = sphi %s1142_s22, %s1376_s22   ;;  %s1084_s21 = sphi %s1140_s21, %s1375_s21  }
   0x6   : > { %s1165_s27 = sadd.s32 1, %s1096_s24   ;;  %s159_s28 = sadd.s32 1, %s1092_s23 }
   0x7   : > { %s156_s29 = ssub.s32 %s1096_s24, %s1165_s27  ;;  %p169_p0 = scmp.ne.s32.totalorder %s1092_s23, %s1088_s22 }
   0x8   : > { %p157_p1 = scmp.eq.s32.totalorder %s156_s29, 0  ;;  %p170_p2 = scmp.eq.s32.totalorder %s1161_s25, 1 }
   0x9   : > { %p175_p3 = scmp.ne.s32.totalorder %s1088_s22, %s1084_s21  ;;  %p176_p4 = scmp.eq.s32.totalorder %s766_s26, 1 }
   0xa   : > { %s1176_s30 = scalar_select %p157_p1, %s1092_s23, %s159_s28  }
   0xb   : > { %p1178_p5 = por %p170_p2, %p169_p0  ;;  %p1182_p6 = por %p176_p4, %p175_p3 }
   0xc   : > { %p767_p7 = scmp.ge.s32.totalorder %s1096_s24, 1  ;;  %p183_p8 = scmp.lt.s32.totalorder %s1096_s24, 3 }
   0xd   : > { %s1367_s8 = scalar_select %p1182_p6, 1, 0 }
   0xe   : > { %p1365_p9 = scmp.eq.s32.totalorder %s1161_s25, 0  ;;  %p1189_p10 = pnand %p767_p7, %p183_p8 }
   0xf   : > { %s1098_s10 = smov [#allocation2]   ;;  %s1099_s13 = smov [#allocation5]  }
  0x10   : > { %s195_s11 = sshll.u32 %s1098_s10, 4  ;;  %p916_p11 = pneg %p1189_p10  ;;  %s196_s11 = int_to_ptr.vmem [resolvable:$true] %s195_s11 }
  0x11   : > { %s217_s14 = sshll.u32 %s1099_s13, 4  ;;  %s987_s15 = scalar_lea.vmem %s196_s11, 4096  ;;  %s218_s14 = int_to_ptr.vmem [resolvable:$true] %s217_s14 }
  0x12   : > { %p1197_p12 = pnand %p1365_p9, %p916_p11  ;;  %p988_p0 = scmp.ne.s32.totalorder %s196_s11, %s987_s15 }
  0x13   : > { %p995_p3 = scmp.lt.s32.totalorder %s196_s11, %s196_s11  ;;  %p996_p4 = scmp.lt.s32.totalorder %s987_s15, %s987_s15 }
  0x14   : > { %p978_p13 = pneg %p1197_p12 }
  0x15   : > { %p997_p7 = por %p996_p4, %p995_p3 }
  0x16   : > { %p990_p1 = pnand %p988_p0, %p978_p13 }
  0x18   : > { %p991_p2 = pneg %p990_p1 }
  0x1a   : > { %p998_p8 = pnand %p997_p7, %p991_p2 }
  0x1c   : > { %1001 = shalt.err (!%p998_p8)
}
  0x1d   : > { %s1100_s16 = smov 128   ;;  %s1101_s17 = smov 8  }
  0x1e   : > { %919 = dma.hbm_to_vmem [thread:$0]  (!%p1197_p12), %s1359_s1, 4096, %s196_s11, [#allocation3], %s1100_s16, %s1100_s16, %s1101_s17  }
  0x1f   : > { %s1013_s20 = scalar_lea.vmem %s218_s14, 4096  ;;  %p1021_p9 = scmp.lt.s32.totalorder %s218_s14, %s218_s14 }
  0x20   : > { %p1014_p11 = scmp.ne.s32.totalorder %s218_s14, %s1013_s20  ;;  %p1022_p6 = scmp.lt.s32.totalorder %s1013_s20, %s1013_s20 }
  0x22   : > { %p1016_p0 = pnand %p1014_p11, %p978_p13  ;;  %p1023_p3 = por %p1022_p6, %p1021_p9 }
  0x24   : > { %p1017_p1 = pneg %p1016_p0 }
  0x26   : > { %p1024_p2 = pnand %p1023_p3, %p1017_p1 }
  0x28   : > { %1027 = shalt.err (!%p1024_p2)
}
  0x29   : > { %922 = dma.hbm_to_vmem [thread:$0]  (!%p1197_p12), %s1363_s5, 4096, %s218_s14, [#allocation6], %s1100_s16, %s1100_s16, %s1101_s17  }
  0x2a   : > { %241 = sbr.rel (%p1189_p10) target bundleno = 1210 (0x4ba), region = 44  ;;  %p1370_p4 = scmp.eq.s32.totalorder (!%p1189_p10), %s1161_s25, 0 }
  0x2f   : > { %1071 = dma.done.wait (%p1370_p4), [#allocation3], 4096   ;;  %p1371_p13 = pmov %p1370_p4 }
  0x30   : > { %p1372_p7 = pmov %p1370_p4 }
  0x31   : > { %1073 = vsyncadd (%p1371_p13), [#allocation3], 4294963200 }
  0x32   : > { %1075 = dma.done.wait (%p1372_p7), [#allocation6], 4096   ;;  %p1373_p6 = pmov %p1370_p4 }
  0x33   : > { %v1102_v0 = vmov 0.0   ;;  %p275_p9 = scmp.lt.s32.totalorder %s1161_s25, 1  ;;  %v313_v1 = vld [vmem:[#allocation2 + $0xf8] sm:$0xff]  ;;  %v312_v3 = vld [vmem:[#allocation2 + $0xf0] sm:$0xff]  ;;  %v311_v5 = vld [vmem:[#allocation2 + $0xe8] sm:$0xff]  ;;  %vm1103_vm0 = vmmov 0  }
  0x34   : > { %1077 = vsyncadd (%p1373_p6), [#allocation6], 4294963200  ;;  %871 = vmatprep.subr.mxu1 %v1102_v0  ;;  %v297_v2 = vld [vmem:[#allocation2 + $0x78] sm:$0xff]  ;;  %784 = vmatprep.subr.mxu0 %v313_v1  ;;  %v296_v4 = vld [vmem:[#allocation2 + $0x70] sm:$0xff]  ;;  %vm478_vm1 = vcmask 64512   ;;  %s272_s26 = sand.u32 1, %s1088_s22  }
  0x35   : > { %s276_s29 = scalar_select %p275_p9, %s1161_s25, 1  ;;  %785 = vmatpush3.msra.mxu0 %v297_v2  ;;  %v295_v6 = vld [vmem:[#allocation2 + $0x68] sm:$0xff]  ;;  %v310_v7 = vld [vmem:[#allocation2 + $0xe0] sm:$0xff]  ;;  %v309_v9 = vld [vmem:[#allocation2 + $0xd8] sm:$0xff]  ;;  %903 = vmatprep.mubr.msk.f32.mxu1 %vm1103_vm0, %v1102_v0 }
  0x36   : > { %786 = vmatprep.subr.mxu0 %v312_v3  ;;  %v294_v8 = vld [vmem:[#allocation2 + $0x60] sm:$0xff]  ;;  %v293_v10 = vld [vmem:[#allocation2 + $0x58] sm:$0xff]  ;;  %v308_v11 = vld [vmem:[#allocation2 + $0xd0] sm:$0xff]  ;;  %s774_s28 = sshll.u32 %s272_s26, 3  ;;  %s672_s14 = scalar_lea.sflag [#allocation4], %s272_s26 }
  0x37   : > { %787 = vmatpush3.msra.mxu0 %v296_v4  ;;  %s783_s9 = sshll.u32 %s276_s29, 4  ;;  %v292_v12 = vld [vmem:[#allocation2 + $0x50] sm:$0xff]  ;;  %v307_v13 = vld [vmem:[#allocation2 + $0xc8] sm:$0xff]  ;;  %v407_v16 = vld [vmem:[%s1361_s3 + $0x78] sm:$0xff]  ;;  %s780_s29 = sshll.u32 %s1161_s25, 7 }
  0x38   : > { %788 = vmatprep.subr.mxu0 %v311_v5  ;;  %s1235_s12 = scalar_lea.vmem %s1358_s0, %s783_s9  ;;  %v291_v15 = vld [vmem:[#allocation2 + $0x48] sm:$0xff]  ;;  %v406_v17 = vld [vmem:[%s1361_s3 + $0x70] sm:$0xff]  ;;  %v306_v18 = vld [vmem:[#allocation2 + $0xc0] sm:$0xff]  ;;  %872 = vmatpush3.msra.mxu1 %v407_v16  ;;  %s274_s9 = scalar_lea.vmem [#allocation7], %s774_s28 }
  0x39   : > { %789 = vmatpush3.msra.mxu0 %v295_v6  ;;  %v1238_v14 = vld [vmem:[%s1235_s12 + $0x8] sm:$0xff]  ;;  %v290_v19 = vld [vmem:[#allocation2 + $0x40] sm:$0xff]  ;;  %873 = vmatprep.subr.mxu1 %v1102_v0  ;;  %v305_v21 = vld [vmem:[#allocation2 + $0xb8] sm:$0xff]  ;;  %s685_s10 = sshll.u32 %s274_s9, 4  ;;  %s683_s13 = scalar_lea.hbm %s1364_s6, %s780_s29  ;;  %s686_s10 = int_to_ptr.vmem [resolvable:$true] %s685_s10 }
  0x3a   : > { %790 = vmatprep.subr.mxu0 %v310_v7  ;;  %385 = vmatprep.mubr.f32.mxu0 %v1238_v14  ;;  %v405_v20 = vld [vmem:[%s1361_s3 + $0x68] sm:$0xff]  ;;  %v289_v22 = vld [vmem:[#allocation2 + $0x38] sm:$0xff]  ;;  %v404_v23 = vld [vmem:[%s1361_s3 + $0x60] sm:$0xff]  ;;  %s1028_s15 = scalar_lea.vmem %s686_s10, 128  ;;  %s1104_s16 = smov [#allocation7]  }
  0x3b   : > { %791 = vmatpush3.msra.mxu0 %v294_v8  ;;  %874 = vmatpush3.msra.mxu1 %v406_v17  ;;  %v304_v24 = vld [vmem:[#allocation2 + $0xb0] sm:$0xff]  ;;  %v403_v26 = vld [vmem:[%s1361_s3 + $0x58] sm:$0xff]  ;;  %v303_v27 = vld [vmem:[#allocation2 + $0xa8] sm:$0xff]  ;;  %p1029_p10 = scmp.ne.s32.totalorder %s686_s10, %s1028_s15  ;;  %s1032_s17 = sshll.u32 %s1104_s16, 4  ;;  %s1033_s17 = int_to_ptr.vmem [resolvable:$false] %s1032_s17 }
  0x3c   : > { %792 = vmatprep.subr.mxu0 %v309_v9  ;;  %875 = vmatprep.subr.mxu1 %v1102_v0  ;;  %v288_v25 = vld [vmem:[#allocation2 + $0x30] sm:$0xff]  ;;  %v287_v28 = vld [vmem:[#allocation2 + $0x28] sm:$0xff]  ;;  %v302_v29 = vld [vmem:[#allocation2 + $0xa0] sm:$0xff]  ;;  %s1034_s25 = scalar_lea.vmem %s1033_s17, 256  ;;  %p1035_p11 = scmp.lt.s32.totalorder %s686_s10, %s1033_s17 }
  0x3d   : > { %793 = vmatpush3.msra.mxu0 %v293_v10  ;;  %876 = vmatpush3.msra.mxu1 %v405_v20  ;;  %v286_v30 = vld [vmem:[#allocation2 + $0x20] sm:$0xff]  ;;  %v301_v31 = vld [vmem:[#allocation2 + $0x98] sm:$0xff]  ;;  %v300_v33 = vld [vmem:[#allocation2 + $0x90] sm:$0xff]  ;;  %p1030_p12 = pnand %p1029_p10, %p1178_p5  ;;  %p1036_p0 = scmp.lt.s32.totalorder %s1034_s25, %s1028_s15 }
  0x3e   : > { %794 = vmatprep.subr.mxu0 %v308_v11  ;;  %877 = vmatprep.subr.mxu1 %v1102_v0  ;;  %v285_v32 = vld [vmem:[#allocation2 + $0x18] sm:$0xff]  ;;  %v284_v34 = vld [vmem:[#allocation2 + $0x10] sm:$0xff]  ;;  %v299_v35 = vld [vmem:[#allocation2 + $0x88] sm:$0xff] }
  0x3f   : > { %795 = vmatpush3.msra.mxu0 %v292_v12  ;;  %878 = vmatpush3.msra.mxu1 %v404_v23  ;;  %v283_v36 = vld [vmem:[#allocation2 + $0x8] sm:$0xff]  ;;  %v298_v37 = vld [vmem:[#allocation2 + $0x80] sm:$0xff]  ;;  %v402_v40 = vld [vmem:[%s1361_s3 + $0x50] sm:$0xff]  ;;  %p1031_p8 = pneg %p1030_p12  ;;  %p1037_p1 = por %p1036_p0, %p1035_p11 }
  0x40   : > { %796 = vmatprep.subr.mxu0 %v307_v13  ;;  %879 = vmatprep.subr.mxu1 %v1102_v0  ;;  %v282_v38 = vld [vmem:[#allocation2] sm:$0xff]  ;;  %v401_v41 = vld [vmem:[%s1361_s3 + $0x48] sm:$0xff]  ;;  %v399_v43 = vld [vmem:[%s1361_s3 + $0x38] sm:$0xff] }
  0x41   : > { %797 = vmatpush3.msra.mxu0 %v291_v15  ;;  %880 = vmatpush3.msra.mxu1 %v403_v26  ;;  %v1262_v39 = vld [vmem:[%s1235_s12] sm:$0xff]  ;;  %v398_v44 = vld [vmem:[%s1361_s3 + $0x30] sm:$0xff]  ;;  %v397_v45 = vld [vmem:[%s1361_s3 + $0x28] sm:$0xff]  ;;  %p1038_p3 = pnand %p1037_p1, %p1031_p8 }
  0x42   : > { %798 = vmatprep.subr.mxu0 %v306_v18  ;;  %881 = vmatprep.subr.mxu1 %v1102_v0  ;;  %v400_v42 = vld [vmem:[%s1361_s3 + $0x40] sm:$0xff]  ;;  %v395_v47 = vld [vmem:[%s1361_s3 + $0x18] sm:$0xff]  ;;  %v394_v48 = vld [vmem:[%s1361_s3 + $0x10] sm:$0xff] }
  0x43   : > { %799 = vmatpush3.msra.mxu0 %v290_v19  ;;  %882 = vmatpush3.msra.mxu1 %v402_v40  ;;  %v396_v46 = vld [vmem:[%s1361_s3 + $0x20] sm:$0xff]  ;;  %v393_v49 = vld [vmem:[%s1361_s3 + $0x8] sm:$0xff]  ;;  %v599_v3 = vld [vmem:[#allocation5 + $0xf8] sm:$0xff] }
  0x44   : > { %800 = vmatprep.subr.mxu0 %v305_v21  ;;  %883 = vmatprep.subr.mxu1 %v1102_v0  ;;  %v392_v50 = vld [vmem:[%s1361_s3] sm:$0xff]  ;;  %v491_v1 = vld [vmem:[%s1362_s4 + $0x8] sm:$0xff]  ;;  %v583_v4 = vld [vmem:[#allocation5 + $0x78] sm:$0xff] }
  0x45   : > { %801 = vmatpush3.msra.mxu0 %v289_v22  ;;  %884 = vmatpush3.msra.mxu1 %v401_v41  ;;  %v777_v52 = vld [vmem:[%s1360_s2] ss:$0 sm:$0xff]  ;;  %v598_v5 = vld [vmem:[#allocation5 + $0xf0] sm:$0xff]  ;;  %v597_v7 = vld [vmem:[#allocation5 + $0xe8] sm:$0xff] }
  0x46   : > { %802 = vmatprep.subr.mxu0 %v304_v24  ;;  %885 = vmatprep.subr.mxu1 %v1102_v0  ;;  %v490_v2 = vld [vmem:[%s1362_s4] sm:$0xff]  ;;  %v582_v6 = vld [vmem:[#allocation5 + $0x70] sm:$0xff]  ;;  %v581_v8 = vld [vmem:[#allocation5 + $0x68] sm:$0xff] }
  0x47   : > { %803 = vmatpush3.msra.mxu0 %v288_v25  ;;  %886 = vmatpush3.msra.mxu1 %v400_v42  ;;  %v596_v9 = vld [vmem:[#allocation5 + $0xe0] sm:$0xff]  ;;  %v595_v11 = vld [vmem:[#allocation5 + $0xd8] sm:$0xff]  ;;  %v594_v13 = vld [vmem:[#allocation5 + $0xd0] sm:$0xff] }
  0x48   : > { %804 = vmatprep.subr.mxu0 %v303_v27  ;;  %887 = vmatprep.subr.mxu1 %v1102_v0  ;;  %v580_v10 = vld [vmem:[#allocation5 + $0x60] sm:$0xff]  ;;  %v579_v12 = vld [vmem:[#allocation5 + $0x58] sm:$0xff]  ;;  %v578_v15 = vld [vmem:[#allocation5 + $0x50] sm:$0xff] }
  0x49   : > { %805 = vmatpush3.msra.mxu0 %v287_v28  ;;  %888 = vmatpush3.msra.mxu1 %v399_v43  ;;  %v593_v16 = vld [vmem:[#allocation5 + $0xc8] sm:$0xff]  ;;  %v592_v18 = vld [vmem:[#allocation5 + $0xc0] sm:$0xff]  ;;  %v591_v20 = vld [vmem:[#allocation5 + $0xb8] sm:$0xff] }
  0x4a   : > { %806 = vmatprep.subr.mxu0 %v302_v29  ;;  %889 = vmatprep.subr.mxu1 %v1102_v0  ;;  %v577_v17 = vld [vmem:[#allocation5 + $0x48] sm:$0xff]  ;;  %v576_v19 = vld [vmem:[#allocation5 + $0x40] sm:$0xff]  ;;  %v575_v21 = vld [vmem:[#allocation5 + $0x38] sm:$0xff] }
  0x4b   : > { %807 = vmatpush3.msra.mxu0 %v286_v30  ;;  %890 = vmatpush3.msra.mxu1 %v398_v44  ;;  %v590_v22 = vld [vmem:[#allocation5 + $0xb0] sm:$0xff]  ;;  %v589_v24 = vld [vmem:[#allocation5 + $0xa8] sm:$0xff]  ;;  %v588_v26 = vld [vmem:[#allocation5 + $0xa0] sm:$0xff] }
  0x4c   : > { %808 = vmatprep.subr.mxu0 %v301_v31  ;;  %891 = vmatprep.subr.mxu1 %v1102_v0  ;;  %v574_v23 = vld [vmem:[#allocation5 + $0x30] sm:$0xff]  ;;  %v573_v25 = vld [vmem:[#allocation5 + $0x28] sm:$0xff]  ;;  %v572_v27 = vld [vmem:[#allocation5 + $0x20] sm:$0xff] }
  0x4d   : > { %809 = vmatpush3.msra.mxu0 %v285_v32  ;;  %892 = vmatpush3.msra.mxu1 %v397_v45  ;;  %v587_v28 = vld [vmem:[#allocation5 + $0x98] sm:$0xff] }
  0x4e   : > { %810 = vmatprep.subr.mxu0 %v300_v33  ;;  %893 = vmatprep.subr.mxu1 %v1102_v0  ;;  %v571_v29 = vld [vmem:[#allocation5 + $0x18] sm:$0xff]  ;;  %v586_v33 = vld [vmem:[#allocation5 + $0x90] sm:$0xff] }
  0x4f   : > { %811 = vmatpush3.msra.mxu0 %v284_v34  ;;  %894 = vmatpush3.msra.mxu1 %v396_v46  ;;  %v570_v34 = vld [vmem:[#allocation5 + $0x10] sm:$0xff] }
  0x50   : > { %812 = vmatprep.subr.mxu0 %v299_v35  ;;  %895 = vmatprep.subr.mxu1 %v1102_v0  ;;  %v585_v35 = vld [vmem:[#allocation5 + $0x88] sm:$0xff] }
  0x51   : > { %813 = vmatpush3.msra.mxu0 %v283_v36  ;;  %896 = vmatpush3.msra.mxu1 %v395_v47  ;;  %v569_v36 = vld [vmem:[#allocation5 + $0x8] sm:$0xff] }
  0x52   : > { %814 = vmatprep.subr.mxu0 %v298_v37  ;;  %897 = vmatprep.subr.mxu1 %v1102_v0  ;;  %v584_v37 = vld [vmem:[#allocation5 + $0x80] sm:$0xff] }
  0x53   : > { %815 = vmatpush3.msra.mxu0 %v282_v38  ;;  %898 = vmatpush3.msra.mxu1 %v394_v48  ;;  %v568_v38 = vld [vmem:[#allocation5] sm:$0xff] }
  0x54   : > { %386 = vmatmul.mubr.f32.vlgmr.msra.gmra.mxu0 %v1262_v39  ;;  %899 = vmatprep.subr.mxu1 %v1102_v0 }
  0x55   : > { %559 = vmatprep.mubr.f32.mxu0 %v1102_v0  ;;  %900 = vmatpush3.msra.mxu1 %v393_v49 }
  0x56   : > { %901 = vmatprep.subr.mxu1 %v1102_v0  ;;  %525 = vmatprep.subr.mxu0 %v491_v1 }
  0x57   : > { %902 = vmatpush3.msra.mxu1 %v392_v50  ;;  %526 = vmatpush1.msra.mxu0 %v490_v2 }
  0x58   : > { %836 = vmatprep.subr.mxu1 %v599_v3 }
 0x114   : > { %v816_v51 = vpop.f32.mrf.mxu0 }
 0x116   : > { %v817_v53 = vpop.f32.mrf.mxu0 }
 0x117   : > { %v818_v54 = vadd.f32 %v817_v53, %v816_v51 }
 0x119   : > { %v388_v55 = vadd.f32 %v818_v54, %v777_v52 }
 0x11b   : > { %970 = vtanh.f32 %v388_v55 }
 0x128   : > { %v971_v56 = vpop.eup %970 }
 0x129   : > { %904 = vmatmul.mubr.f32.vlgmr.msra.gmra.mxu1 %v971_v56 }
 0x12a   : > { %837 = vmatpush3.msra.mxu1 %v583_v4 }
 0x12b   : > { %838 = vmatprep.subr.mxu1 %v598_v5 }
 0x12c   : > { %839 = vmatpush3.msra.mxu1 %v582_v6 }
 0x12d   : > { %840 = vmatprep.subr.mxu1 %v597_v7 }
 0x12e   : > { %841 = vmatpush3.msra.mxu1 %v581_v8 }
 0x12f   : > { %842 = vmatprep.subr.mxu1 %v596_v9 }
 0x130   : > { %843 = vmatpush3.msra.mxu1 %v580_v10 }
 0x131   : > { %844 = vmatprep.subr.mxu1 %v595_v11 }
 0x132   : > { %845 = vmatpush3.msra.mxu1 %v579_v12 }
 0x133   : > { %846 = vmatprep.subr.mxu1 %v594_v13 }
 0x134   : > { %847 = vmatpush3.msra.mxu1 %v578_v15 }
 0x135   : > { %848 = vmatprep.subr.mxu1 %v593_v16 }
 0x136   : > { %849 = vmatpush3.msra.mxu1 %v577_v17 }
 0x137   : > { %850 = vmatprep.subr.mxu1 %v592_v18 }
 0x138   : > { %851 = vmatpush3.msra.mxu1 %v576_v19 }
 0x139   : > { %852 = vmatprep.subr.mxu1 %v591_v20 }
 0x13a   : > { %853 = vmatpush3.msra.mxu1 %v575_v21 }
 0x13b   : > { %854 = vmatprep.subr.mxu1 %v590_v22 }
 0x13c   : > { %855 = vmatpush3.msra.mxu1 %v574_v23 }
 0x13d   : > { %856 = vmatprep.subr.mxu1 %v589_v24 }
 0x13e   : > { %857 = vmatpush3.msra.mxu1 %v573_v25 }
 0x13f   : > { %858 = vmatprep.subr.mxu1 %v588_v26 }
 0x140   : > { %859 = vmatpush3.msra.mxu1 %v572_v27 }
 0x141   : > { %860 = vmatprep.subr.mxu1 %v587_v28 }
 0x142   : > { %861 = vmatpush3.msra.mxu1 %v571_v29 }
 0x143   : > { %862 = vmatprep.subr.mxu1 %v586_v33 }
 0x144   : > { %863 = vmatpush3.msra.mxu1 %v570_v34 }
 0x145   : > { %864 = vmatprep.subr.mxu1 %v585_v35 }
 0x146   : > { %865 = vmatpush3.msra.mxu1 %v569_v36 }
 0x147   : > { %866 = vmatprep.subr.mxu1 %v584_v37 }
 0x148   : > { %867 = vmatpush3.msra.mxu1 %v568_v38 }
 0x1e9   : > { %v474_v57 = vpop.f32.mrf.mxu1 }
 0x1ea   : > { %v479_v58 = vsel %vm478_vm1, %v474_v57, -inf }
 0x1eb   : > { %480 = vmax.xlane.f32.xlu0 %v479_v58  ;;  %v905_v59 = vpop.f32.mrf.mxu1 }
 0x274   : > { %v481_v60 = vpop.xlane.xlu0 %480 }
 0x275   : > { %v482_v61 = vsub.f32 %v474_v57, %v481_v60 }
 0x277   : > { %v483_v62 = vmul.f32 1.442695, %v482_v61 }
 0x279   : > { %972 = vpow2.f32 %v483_v62 }
 0x286   : > { %v973_v63 = vpop.eup %972 }
 0x287   : > { %v485_v0 = vsel %vm478_vm1, %v973_v63, 0.0 }
 0x288   : > { %486 = vadd.xlane.f32.xlu0 %v485_v0 }
 0x311   : > { %v487_v30 = vpop.xlane.xlu0 %486 }
 0x312   : > { %974 = vrcp.f32 %v487_v30 }
 0x31f   : > { %v975_v31 = vpop.eup %974 }
 0x320   : > { %v489_v32 = vmul.f32 %v975_v31, %v973_v63 }
 0x322   : > { %778 = vmatmul.mubr.msk.f32.vlgmr.msra.gmra.mxu0 %vm478_vm1, %v489_v32 }
 0x3e2   : > { %v561_v40 = vpop.f32.mrf.mxu0 }
 0x3e3   : > { %v566_v43 = vmul.f32 %v561_v40, %v1262_v39 }
 0x3e4   : > { %v563_v41 = vpop.f32.mrf.mxu0 }
 0x3e5   : > { %v567_v42 = vmul.f32 %v563_v41, %v1238_v14 }
 0x3e7   : > { %664 = vmatprep.mubr.f32.mxu1 %v567_v42 }
 0x3e8   : > { %665 = vmatmul.mubr.f32.vlgmr.msra.gmra.mxu1 %v566_v43 }
 0x4a8   : > { %v868_v44 = vpop.f32.mrf.mxu1 }
 0x4aa   : > { %v869_v45 = vpop.f32.mrf.mxu1 }
 0x4ab   : > { %v870_v46 = vadd.f32 %v869_v45, %v868_v44 }
 0x4ad   : > { %670 = vst [vmem:[%s274_s9] sm:$0xff] %v870_v46 }
 0x4ae   : > { %1041 = shalt.err (!%p1038_p3)
}
 0x4af   : > { %s1042_s18 = scalar_lea.hbm %s683_s13, 128  ;;  %s1046_s26 = scalar_lea.hbm %s1364_s6, 256 }
 0x4b0   : > { %p1043_p2 = scmp.ne.s32.totalorder %s683_s13, %s1042_s18  ;;  %p1047_p7 = scmp.lt.s32.totalorder %s683_s13, %s1364_s6 }
 0x4b1   : > { %p1048_p6 = scmp.lt.s32.totalorder %s1046_s26, %s1042_s18 }
 0x4b2   : > { %p1044_p4 = pnand %p1043_p2, %p1178_p5 }
 0x4b3   : > { %p1049_p9 = por %p1048_p6, %p1047_p7 }
 0x4b4   : > { %p1045_p13 = pneg %p1044_p4 }
 0x4b6   : > { %p1050_p10 = pnand %p1049_p9, %p1045_p13 }
 0x4b8   : > { %1053 = shalt.err (!%p1050_p10)
}
 0x4b9   : > { %914 = dma.vmem_to_hbm [thread:$0]  (%p1178_p5), %s686_s10, 128, %s683_s13, %s672_s14  }
 0x4ba PF: > { %p931_p12 = scmp.ge.s32.totalorder %s1096_s24, 2  ;;  %s697_s9 = sand.u32 1, %s1084_s21  }
 0x4bb   : > { %p1374_p8 = scmp.ne.s32.totalorder %s1367_s8, 0  ;;  %s698_s11 = scalar_lea.sflag [#allocation4], %s697_s9 }
 0x4bd   : > { %p924_p11 = pnand %p931_p12, %p1374_p8 }
 0x4bf   : > { %p925_p0 = pneg %p924_p11 }
 0x4c1   : > { %1079 = dma.done.wait (%p925_p0), %s698_s11, 128  }
 0x4c2   : > { %1081 = vsyncadd (%p925_p0), %s698_s11, 4294967168  ;;  %p18_p1 = scmp.ge.s32.totalorder %s1165_s27, 4   ;;  %s1375_s21 = smov %s1088_s22 }
 0x4c3   : > { %s1376_s22 = smov %s1092_s23  ;;  %s1377_s23 = smov %s1176_s30 }
 0x4c4   : > { %s1378_s24 = smov %s1165_s27  ;;  %20 = sbr.rel (!%p18_p1) target bundleno = 5 (0x5), region = 88 }
 0x4c9   :  { %703 = vsyncpa [#allocation3], 1 }
 0x4ca   :  { %705 = vsyncpa [#allocation3 + $0x1], 1 }
 0x4cb   :  { %706 = vsyncpa [#allocation6], 1 }
 0x4cc   :  { %707 = vsyncpa [#allocation4], 1 }
 0x4cd   :  { %709 = vsyncpa [#allocation4 + $0x1], 1 }

</bundles_post_ra>
